<compile_context>
chip_gen: v7x
topology: tpu7x:2x2x1
jax: 0.10.0
libtpu: 0.0.40
codegen_flags: <defaults>
</compile_context>

<pallas_src>
import math

import jax
import jax.numpy as jnp
from jax import lax
from jax.experimental import pallas as pl
from jax.experimental.pallas import tpu as pltpu


def _pick_tile(dim: int, candidates) -> int:
    """Largest candidate tile that divides `dim`, else the full dimension."""
    for c in candidates:
        if dim % c == 0:
            return c
    return dim


# ----------------------------------------------------------------------------
# Kernel 1: per-head-slot QKV projection
#   out[j, m, :] = x[m, :] @ w_heads[j] + b_heads[j]      (j = 0..3H-1)
# ----------------------------------------------------------------------------
def _qkv_proj_kernel(x_ref, w_ref, b_ref, o_ref):
    x = x_ref[...].astype(jnp.bfloat16)                 # bf16 operands -> native MXU
    acc = jnp.dot(x, w_ref[...], preferred_element_type=jnp.float32)
    o_ref[...] = (acc + b_ref[...].astype(jnp.float32)).astype(o_ref.dtype)


def qkv_head_projection(x2d, w_heads, b_heads):
    """x2d: [M, E] f32, w_heads: [3H, E, Dh] bf16, b_heads: [3H, 1, Dh] f32
    -> [3H, M, Dh] bf16 (head-major: q heads, then k heads, then v heads)."""
    m, e = x2d.shape
    slots, e2, dh = w_heads.shape
    assert e == e2
    # Contraction dim E stays whole in one block (fits VMEM for typical
    # d_model); the x block is resident across the head-slot axis, only the
    # tiny per-head weight block is re-fetched each step.
    tm = _pick_tile(m, (256, 128, 64, 32, 16, 8))
    grid = (m // tm, slots)
    return pl.pallas_call(
        _qkv_proj_kernel,
        out_shape=jax.ShapeDtypeStruct((slots, m, dh), jnp.bfloat16),
        grid=grid,
        in_specs=[
            pl.BlockSpec((tm, e), lambda i, j: (i, 0)),
            pl.BlockSpec((None, e, dh), lambda i, j: (j, 0, 0)),
            pl.BlockSpec((None, 1, dh), lambda i, j: (j, 0, 0)),
        ],
        out_specs=pl.BlockSpec((None, tm, dh), lambda i, j: (j, i, 0)),
        compiler_params=pltpu.CompilerParams(
            dimension_semantics=("parallel", "parallel")),
    )(x2d, w_heads, b_heads)


# ----------------------------------------------------------------------------
# Kernel 2: causal flash attention (online softmax), heads indexed via specs
# ----------------------------------------------------------------------------
def _flash_attn_kernel(q_ref, k_ref, v_ref, o_ref, m_scr, l_scr, acc_scr):
    qi = pl.program_id(2)
    ki = pl.program_id(3)

    @pl.when(ki == 0)
    def _():
        m_scr[...] = jnp.full_like(m_scr, -jnp.inf)
        l_scr[...] = jnp.zeros_like(l_scr)
        acc_scr[...] = jnp.zeros_like(acc_scr)

    def update(masked):
        q = q_ref[...]                                    # (blk, dh) bf16
        k = k_ref[...]                                    # (blk, dh) bf16
        # q @ k^T (scale already folded into the q projection weights).
        s = lax.dot_general(q, k, (((1,), (1,)), ((), ())),
                            preferred_element_type=jnp.float32)
        if masked:
            # Diagonal tile only: local offsets suffice since block_q == block_k.
            row = lax.broadcasted_iota(jnp.int32, s.shape, 0)
            col = lax.broadcasted_iota(jnp.int32, s.shape, 1)
            s = jnp.where(col <= row, s, -1e9)            # same fill as torch module
        m_prev = m_scr[...]
        m_new = jnp.maximum(m_prev, s.max(axis=-1, keepdims=True))
        alpha = jnp.exp(m_prev - m_new)
        p = jnp.exp(s - m_new)
        l_scr[...] = alpha * l_scr[...] + p.sum(axis=-1, keepdims=True)
        acc_scr[...] = alpha * acc_scr[...] + jnp.dot(
            p.astype(v_ref.dtype), v_ref[...], preferred_element_type=jnp.float32)
        m_scr[...] = m_new

    @pl.when(ki < qi)                 # strictly-below-diagonal tiles: no mask work
    def _():
        update(masked=False)

    @pl.when(ki == qi)                # diagonal tile: mask + finalize
    def _():
        update(masked=True)
        o_ref[...] = (acc_scr[...] *
                      pl.reciprocal(l_scr[...], approx=True)).astype(o_ref.dtype)
    # ki > qi: fully masked tile -> no compute, and the K/V index maps are
    # clamped so no new DMA is issued either.


def flash_causal_attention(qkv_heads, num_heads):
    """qkv_heads: [3H, N, T, Dh] (q heads, then k heads, then v heads).
    Returns [H, N, T, Dh] causal attention output (same dtype)."""
    three_h, n, t, dh = qkv_heads.shape
    h = num_heads
    assert three_h == 3 * h
    blk = _pick_tile(t, (256, 128))         # seq tile; falls back to full T
    grid = (h, n, t // blk, t // blk)

    return pl.pallas_call(
        _flash_attn_kernel,
        out_shape=jax.ShapeDtypeStruct((h, n, t, dh), qkv_heads.dtype),
        grid=grid,
        in_specs=[
            pl.BlockSpec((None, None, blk, dh),
                         lambda hh, nn, qi, ki: (hh, nn, qi, 0)),
            pl.BlockSpec((None, None, blk, dh),
                         lambda hh, nn, qi, ki: (h + hh, nn, jnp.minimum(ki, qi), 0)),
            pl.BlockSpec((None, None, blk, dh),
                         lambda hh, nn, qi, ki: (2 * h + hh, nn, jnp.minimum(ki, qi), 0)),
        ],
        out_specs=pl.BlockSpec((None, None, blk, dh),
                               lambda hh, nn, qi, ki: (hh, nn, qi, 0)),
        scratch_shapes=[
            pltpu.VMEM((blk, 1), jnp.float32),    # running max
            pltpu.VMEM((blk, 1), jnp.float32),    # running denom
            pltpu.VMEM((blk, dh), jnp.float32),   # output accumulator
        ],
        compiler_params=pltpu.CompilerParams(
            dimension_semantics=("parallel", "parallel", "parallel", "arbitrary")),
    )(qkv_heads, qkv_heads, qkv_heads)


# ----------------------------------------------------------------------------
# Kernel 3: head-merge + output projection
#   out[m, :] = sum_h o_heads[h, m, :] @ wo_heads[h] + bo
# (the head-sum replaces the merge transpose; accumulates directly in the f32
#  output block, no scratch)
# ----------------------------------------------------------------------------
def _merge_proj_kernel(oh_ref, w_ref, b_ref, out_ref):
    @pl.when(pl.program_id(2) == 0)
    def _():
        out_ref[...] = jnp.broadcast_to(
            b_ref[...].astype(out_ref.dtype), out_ref.shape)
    out_ref[...] += jnp.dot(oh_ref[...], w_ref[...],
                            preferred_element_type=jnp.float32).astype(out_ref.dtype)


def merge_head_projection(o_heads, w_heads, bias2d, out_dtype):
    """o_heads: [H, M, Dh] bf16, w_heads: [H, Dh, E] bf16, bias2d: [1, E] f32
    -> [M, E] out_dtype (f32 here, so direct accumulation is exact)."""
    h, m, dh = o_heads.shape
    _, _, e = w_heads.shape
    tm = _pick_tile(m, (256, 128, 64, 32, 16, 8))
    tn = _pick_tile(e, (512, 256, 128))
    grid = (m // tm, e // tn, h)
    return pl.pallas_call(
        _merge_proj_kernel,
        out_shape=jax.ShapeDtypeStruct((m, e), out_dtype),
        grid=grid,
        in_specs=[
            pl.BlockSpec((None, tm, dh), lambda i, j, hh: (hh, i, 0)),
            pl.BlockSpec((None, dh, tn), lambda i, j, hh: (hh, 0, j)),
            pl.BlockSpec((1, tn), lambda i, j, hh: (0, j)),
        ],
        out_specs=pl.BlockSpec((tm, tn), lambda i, j, hh: (i, j)),
        compiler_params=pltpu.CompilerParams(
            dimension_semantics=("parallel", "parallel", "arbitrary")),
    )(o_heads, w_heads, bias2d)


# ----------------------------------------------------------------------------
# Full MHA forward
# ----------------------------------------------------------------------------
def mha_forward(x, wq, bq, wk, bk, wv, bv, wo, bo, num_heads):
    n, t, e = x.shape
    h = num_heads
    dh = e // h
    assert x.dtype == jnp.float32  # merge kernel accumulates directly into f32 out

    # Fold the softmax scale into the Q projection (exact, free).
    sm_scale = 1.0 / math.sqrt(dh)
    wq_s, bq_s = wq * sm_scale, bq * sm_scale

    # Per-head weight slices (tiny weight-only reshapes/transposes).
    def w_per_head(w):    # [E, E] -> [H, E, Dh]
        return w.reshape(e, h, dh).transpose(1, 0, 2)

    def b_per_head(b):    # [E] -> [H, 1, Dh]
        return b.reshape(h, 1, dh)

    wqkv = jnp.concatenate(
        [w_per_head(wq_s), w_per_head(wk), w_per_head(wv)], axis=0
    ).astype(jnp.bfloat16)                               # [3H, E, Dh]
    bqkv = jnp.concatenate(
        [b_per_head(bq_s), b_per_head(bk), b_per_head(bv)], axis=0
    ).astype(jnp.float32)                                # [3H, 1, Dh]

    x2d = x.reshape(n * t, e)

    # 1) Fused, head-major QKV projection (one pass over x, bf16 output).
    qkv_h = qkv_head_projection(x2d, wqkv, bqkv)          # [3H, N*T, Dh] bf16
    qkv_h = qkv_h.reshape(3 * h, n, t, dh)                # free reshape

    # 2) Causal flash attention; heads indexed directly through BlockSpecs.
    o_heads = flash_causal_attention(qkv_h, num_heads=h)  # [H, N, T, Dh] bf16
    o_heads = o_heads.reshape(h, n * t, dh)               # free reshape

    # 3) Head-merge + output projection (reduction over heads, bias add).
    wo_h = wo.reshape(h, dh, e).astype(jnp.bfloat16)      # [H, Dh, E], free reshape
    out = merge_head_projection(o_heads, wo_h, bo.reshape(1, e).astype(jnp.float32),
                                out_dtype=x.dtype)        # [N*T, E] f32
    return out.reshape(n, t, e)


# ----------------------------------------------------------------------------
# Pure-JAX reference (mirrors the PyTorch module exactly, eval mode, f32)
# ----------------------------------------------------------------------------
def mha_ref(x, wq, bq, wk, bk, wv, bv, wo, bo, num_heads):
    n, t, e = x.shape
    dh = e // num_heads

    def heads(a):
        return a.reshape(n, t, num_heads, dh).transpose(0, 2, 1, 3)

    q, k, v = heads(x @ wq + bq), heads(x @ wk + bk), heads(x @ wv + bv)
    scores = jnp.einsum('nhqd,nhkd->nhqk', q, k) / math.sqrt(dh)
    causal = jnp.tril(jnp.ones((t, t), dtype=bool))
    scores = jnp.where(causal[None, None], scores, -1e9)
    p = jax.nn.softmax(scores, axis=-1)
    o = jnp.einsum('nhqk,nhkd->nhqd', p, v)
    o = o.transpose(0, 2, 1, 3).reshape(n, t, e)
    return o @ wo + bo


if __name__ == "__main__":
    N, T, D_MODEL, NUM_HEADS = 2, 8, 32, 4
    key = jax.random.PRNGKey(0)
    ks = jax.random.split(key, 9)
    scale = 1.0 / math.sqrt(D_MODEL)

    x = jax.random.normal(ks[0], (N, T, D_MODEL), dtype=jnp.float32)
    wq = jax.random.normal(ks[1], (D_MODEL, D_MODEL), jnp.float32) * scale
    wk = jax.random.normal(ks[2], (D_MODEL, D_MODEL), jnp.float32) * scale
    wv = jax.random.normal(ks[3], (D_MODEL, D_MODEL), jnp.float32) * scale
    wo = jax.random.normal(ks[4], (D_MODEL, D_MODEL), jnp.float32) * scale
    bq = jax.random.normal(ks[5], (D_MODEL,), jnp.float32) * 0.1
    bk = jax.random.normal(ks[6], (D_MODEL,), jnp.float32) * 0.1
    bv = jax.random.normal(ks[7], (D_MODEL,), jnp.float32) * 0.1
    bo = jax.random.normal(ks[8], (D_MODEL,), jnp.float32) * 0.1

    out = mha_forward(x, wq, bq, wk, bk, wv, bv, wo, bo, NUM_HEADS)
    out = jax.block_until_ready(out)

    ref = mha_ref(x, wq, bq, wk, bk, wv, bv, wo, bo, NUM_HEADS)
    assert out.shape == ref.shape and out.dtype == ref.dtype
    # bf16 MXU operands + approx reciprocal -> slightly looser tolerance vs f32 ref.
    assert jnp.allclose(out, ref, atol=5e-2, rtol=5e-2), "mismatch vs reference"

    print("KERNEL_OK")
</pallas_src>

<mosaic_0001>
module attributes {stable_mosaic.version = 11 : i64} {
  func.func @_qkv_proj_kernel(%arg0: i32, %arg1: i32, %arg2: memref<16x32xf32, #tpu.memory_space<vmem>>, %arg3: memref<1x32x8xbf16, #tpu.memory_space<vmem>>, %arg4: memref<1x1x8xf32, #tpu.memory_space<vmem>>, %arg5: memref<1x16x8xbf16, #tpu.memory_space<vmem>>) attributes {dimension_semantics = [#tpu.dimension_semantics<parallel>, #tpu.dimension_semantics<parallel>], iteration_bounds = array<i64: 1, 12>, scalar_prefetch = 0 : i64, scratch_operands = 0 : i64, tpu.core_type = #tpu.core_type<tc>, window_params = [{transform_indices = @transform_0, window_bounds = array<i64: 16, 32>}, {transform_indices = @transform_1, window_bounds = array<i64: 1, 32, 8>}, {transform_indices = @transform_2, window_bounds = array<i64: 1, 1, 8>}, {transform_indices = @transform_3, window_bounds = array<i64: 1, 16, 8>}]} {
    %c0 = arith.constant 0 : index
    %c0_0 = arith.constant 0 : index
    %0 = vector.load %arg2[%c0, %c0_0] : memref<16x32xf32, #tpu.memory_space<vmem>>, vector<16x32xf32>
    %1 = arith.truncf %0 : vector<16x32xf32> to vector<16x32xbf16>
    %c0_1 = arith.constant 0 : index
    %c0_2 = arith.constant 0 : index
    %c0_3 = arith.constant 0 : index
    %2 = vector.load %arg3[%c0_1, %c0_2, %c0_3] : memref<1x32x8xbf16, #tpu.memory_space<vmem>>, vector<1x32x8xbf16>
    %3 = vector.shape_cast %2 : vector<1x32x8xbf16> to vector<32x8xbf16>
    %cst = arith.constant dense<0.000000e+00> : vector<16x8xf32>
    %4 = tpu.matmul %1, %3, %cst {dimension_numbers = #tpu.dot_dimension_numbers<[1], [0], [0], [1], [0, 0, 1, 1], [], []>} : vector<16x32xbf16>, vector<32x8xbf16>, vector<16x8xf32> -> vector<16x8xf32>
    %c0_4 = arith.constant 0 : index
    %c0_5 = arith.constant 0 : index
    %c0_6 = arith.constant 0 : index
    %5 = vector.load %arg4[%c0_4, %c0_5, %c0_6] : memref<1x1x8xf32, #tpu.memory_space<vmem>>, vector<1x1x8xf32>
    %6 = vector.shape_cast %5 : vector<1x1x8xf32> to vector<1x8xf32>
    %7 = vector.broadcast %6 : vector<1x8xf32> to vector<16x8xf32>
    %8 = arith.addf %4, %7 : vector<16x8xf32>
    %9 = arith.truncf %8 : vector<16x8xf32> to vector<16x8xbf16>
    %c0_7 = arith.constant 0 : index
    %c0_8 = arith.constant 0 : index
    %c0_9 = arith.constant 0 : index
    %10 = vector.load %arg5[%c0_7, %c0_8, %c0_9] : memref<1x16x8xbf16, #tpu.memory_space<vmem>>, vector<1x16x8xbf16>
    %11 = vector.shape_cast %10 : vector<1x16x8xbf16> to vector<16x8xbf16>
    %12 = vector.shape_cast %9 : vector<16x8xbf16> to vector<1x16x8xbf16>
    tpu.vector_store %arg5[%c0_7, %c0_8, %c0_9], %12 {strides = array<i32>} : memref<1x16x8xbf16, #tpu.memory_space<vmem>>, vector<1x16x8xbf16>,
    return
  }
  func.func @transform_0(%arg0: i32, %arg1: i32) -> (i32, i32) {
    %c0_i32 = arith.constant 0 : i32
    %c0_i32_0 = arith.constant 0 : i32
    return %arg0, %c0_i32 : i32, i32
  }
  func.func @transform_1(%arg0: i32, %arg1: i32) -> (i32, i32, i32) {
    %c0_i32 = arith.constant 0 : i32
    %c0_i32_0 = arith.constant 0 : i32
    %c0_i32_1 = arith.constant 0 : i32
    return %arg1, %c0_i32, %c0_i32_0 : i32, i32, i32
  }
  func.func @transform_2(%arg0: i32, %arg1: i32) -> (i32, i32, i32) {
    %c0_i32 = arith.constant 0 : i32
    %c0_i32_0 = arith.constant 0 : i32
    %c0_i32_1 = arith.constant 0 : i32
    return %arg1, %c0_i32, %c0_i32_0 : i32, i32, i32
  }
  func.func @transform_3(%arg0: i32, %arg1: i32) -> (i32, i32, i32) {
    %c0_i32 = arith.constant 0 : i32
    %c0_i32_0 = arith.constant 0 : i32
    return %arg1, %arg0, %c0_i32 : i32, i32, i32
  }
}

</mosaic_0001>

<bundles_post_ra>
// kernel: tpu_custom_call.1
= control target key start
LH: loop header
LB: loop body
LE: loop exit
PB: predicated region body
PF: predicated region fallthrough
CT: control target
= control target key end

     0   :  { %s525_s12 = smov 0   ;;  %s527_s13 = smov 0   ;;  %s567_s0 = inlined_call_operand.vmem [shape: f32[16,32], index: 0, kind: input, shape index: {}]   ;;  %s568_s1 = inlined_call_operand.vmem [shape: bf16[12,32,8], index: 1, kind: input, shape index: {}]   ;;  %s569_s2 = inlined_call_operand.vmem [shape: f32[12,1,8], index: 2, kind: input, shape index: {}]   ;;  %s570_s3 = inlined_call_operand.vmem [shape: bf16[12,16,8], index: 3, kind: output, shape index: {}]  }
   0x1   :  { %s529_s14 = smov 0  }
   0x2 LB: > { %s22_s15 = sadd.s32 1, %s497_s13  ;;  %p423_p0 = scmp.ge.s32.totalorder %s501_s14, 1  ;;  %s501_s14 = sphi %s529_s14, %s13_s14   ;;  %s497_s13 = sphi %s527_s13, %s572_s13   ;;  %s493_s12 = sphi %s525_s12, %s571_s12  }
   0x3   : > { %p23_p1 = scmp.ge.s32.totalorder %s22_s15, 12  ;;  %p170_p2 = scmp.lt.s32.totalorder %s501_s14, 13 }
   0x5   : > { %s574_s15 = smov (%p23_p1, %s22_s15), 0  ;;  %p171_p3 = pnand %p423_p0, %p170_p2 }
   0x6   : > { %p212_p4 = scmp.lt.s32.totalorder (!%p171_p3), %s493_s12, 11  ;;  %v503_v0 = vmov (!%p171_p3), 0.0   ;;  %vm504_vm0 = vmmov (!%p171_p3), 0   ;;  %v231_v3 = vld [vmem:[%s567_s0] sm:$0xff] (!%p171_p3)  ;;  %v232_v4 = vld [vmem:[%s567_s0 + $0x8] sm:$0xff] (!%p171_p3)  ;;  %vm257_vm1 = vcmask (!%p171_p3), 261120  }
   0x7   : > { %174 = sbr.rel (%p171_p3) target bundleno = 244 (0xf4), region = 32  ;;  %443 = vmatprep.subr.bf16.mxu0 (!%p171_p3), %v503_v0  ;;  %447 = vmatprep.mubr.msk.bf16.mxu0 (!%p171_p3), %vm504_vm0, %v503_v0  ;;  %v233_v5 = vpack.c.bf16 (!%p171_p3), %v232_v4, %v231_v3  ;;  %vm310_vm2 = vcmask (!%p171_p3), 60416  }
   0xe   : > { %s576_s12 = smov (!%p212_p4, %s493_s12), 11 }
   0xf   : > { %s436_s16 = sshll.u32 %s576_s12, 4  ;;  %s219_s26 = scalar_lea.vmem %s569_s2, %s576_s12 }
  0x10   : > { %s216_s19 = scalar_lea.vmem %s568_s1, %s436_s16  ;;  %v428_v6 = vld [vmem:[%s219_s26] ss:$0 sm:$0xff]  ;;  %s437_s27 = sshll.u32 %s576_s12, 3 }
  0x11   : > { %v477_v1 = vld [vmem:[%s216_s19] sm:$0xff]   ;;  %v478_v2 = vld [vmem:[%s216_s19 + $0x8] sm:$0xff]   ;;  %s228_s30 = scalar_lea.vmem %s570_s3, %s437_s27 }
  0x12   : > { %444 = vmatpush3.bf16.msra.mxu0 %v477_v1 }
  0x13   : > { %445 = vmatprep.subr.bf16.mxu0 %v503_v0 }
  0x16   : > { %446 = vmatpush3.bf16.msra.mxu0 %v478_v2 }
  0x19   : > { %448 = vmatmul.mubr.msk.bf16.vlgmr.msra.gmra.mrb[0].mxu0 %vm257_vm1, %v233_v5 }
  0xec   : > { %v295_v7 = vpop.f32.mrb[0].mxu0 }
  0xed   : > { %v296_v8 = vadd.f32 %v428_v6, %v295_v7  ;;  %v449_v9 = vpop.f32.mrb[1].mxu0 }
  0xee   : > { %v298_v10 = vpop.f32.mrb[2].mxu0 }
  0xef   : > { %v438_v11 = vpack.c.bf16 %v296_v8, %v296_v8  ;;  %v299_v12 = vadd.f32 %v428_v6, %v298_v10  ;;  %v450_v13 = vpop.f32.mrb[3].mxu0 }
  0xf1   : > { %311 = vst.msk [vmem:[%s228_s30] sm:$0xf] %vm310_vm2, %v438_v11  ;;  %v439_v14 = vpack.c.bf16 %v299_v12, %v299_v12 }
  0xf3   : > { %312 = vst.msk [vmem:[%s228_s30 + $0x4] sm:$0xf] %vm310_vm2, %v439_v14 }
  0xf4 PF: > { %s13_s14 = sadd.s32 1, %s501_s14   ;;  %s571_s12 = smov %s497_s13 }
  0xf5   : > { %p10_p5 = scmp.ge.s32.totalorder %s13_s14, 14   ;;  %s572_s13 = smov %s574_s15 }
  0xf7   :  { %12 = sbr.rel (!%p10_p5) target bundleno = 2 (0x2), region = 68 }

</bundles_post_ra>
